<compile_context>
chip_gen: v7x
topology: tpu7x:2x2x1
jax: 0.10.0
libtpu: 0.0.40
codegen_flags: <defaults>
</compile_context>

<pallas_src>
import functools

import jax
import jax.numpy as jnp
from jax.experimental import pallas as pl
from jax.experimental.pallas import tpu as pltpu


_STRIP = 8  # sublane-sized register strip for the compare kernel


def _round_up(x, m):
    return ((x + m - 1) // m) * m


def _cdiv(a, b):
    return (a + b - 1) // b


def _pick_tiles(q_pad, k_pad, q_tile_max, k_tile_max):
    q_tile = min(q_tile_max, q_pad)
    k_tile = min(k_tile_max, k_pad)
    # Guarantee >= 2 grid steps along a "parallel" axis when the problem can be
    # split, so both v7x TensorCores get work. No effect on v5e/v6e (1 TC).
    if _cdiv(q_pad, q_tile) * _cdiv(k_pad, k_tile) < 2:
        if k_pad >= 2 * 128:
            k_tile = _round_up(_cdiv(k_pad, 2), 128)
        elif q_pad >= 2 * 8:
            q_tile = _round_up(_cdiv(q_pad, 2), 8)
    return q_tile, k_tile


# ----------------------------------------------------------------------------
# Path A: general integer-label compare kernel (register-blocked strips).
# ----------------------------------------------------------------------------
def _iou_compare_kernel(qry_ref, key_t_ref, out_ref):
    # qry_ref:   (q_tile, QC) int32   -- one tile of query tasks
    # key_t_ref: (KC, k_tile) int32   -- key categories, key tasks lane-dense
    # out_ref:   (q_tile, k_tile) f32 -- lane-dense IoU tile
    q_t, qc = qry_ref.shape
    kc, k_t = key_t_ref.shape

    # Hoisted sublane broadcasts of the key rows: once per kernel invocation,
    # shared by every strip. (1, k_t) and (_STRIP, k_t) cost the same vregs.
    key_rows = [
        jnp.broadcast_to(key_t_ref[b:b + 1, :], (_STRIP, k_t)) for b in range(kc)
    ]

    def strip_body(s, carry):
        i0 = pl.multiple_of(s * _STRIP, _STRIP)
        q_strip = qry_ref[pl.ds(i0, _STRIP), :]          # (_STRIP, qc), tiny
        acc = jnp.zeros((_STRIP, k_t), jnp.int32)        # a few vregs, stays live
        for a in range(qc):
            # Lane broadcast hoisted out of the key loop: once per query column.
            qa = jnp.broadcast_to(q_strip[:, a:a + 1], (_STRIP, k_t))
            for b in range(kc):
                acc = acc + (qa == key_rows[b]).astype(jnp.int32)
        n_int = acc.astype(jnp.float32)                  # one int->float cast
        union = jnp.float32(qc + kc) - n_int
        # Exact reciprocal (approx=False) keeps results bit-close to a divide.
        out_ref[pl.ds(i0, _STRIP), :] = n_int * pl.reciprocal(union)
        return carry

    jax.lax.fori_loop(0, q_t // _STRIP, strip_body, 0)


def _category_iou_compare(qry_labels, key_labels, *, q_tile_max=256, k_tile_max=1024):
    q, qc = qry_labels.shape
    k, kc = key_labels.shape

    # Pad only to (sublane, lane) = (8, 128) alignment; the cdiv grid handles
    # the ragged final blocks and the wrapper slices the valid region back out.
    q_pad = _round_up(q, 8)
    k_pad = _round_up(k, 128)
    q_tile, k_tile = _pick_tiles(q_pad, k_pad, q_tile_max, k_tile_max)

    # Distinct sentinels for padding; padded rows/cols only affect output
    # entries that are sliced away below.
    qry_p = jnp.pad(qry_labels, ((0, q_pad - q), (0, 0)), constant_values=-1)
    key_p = jnp.pad(key_labels, ((0, k_pad - k), (0, 0)), constant_values=-2)
    key_t = key_p.T  # (KC, K_pad): key tasks along the lane axis

    out = pl.pallas_call(
        _iou_compare_kernel,
        out_shape=jax.ShapeDtypeStruct((q_pad, k_pad), jnp.float32),
        grid=(_cdiv(q_pad, q_tile), _cdiv(k_pad, k_tile)),
        in_specs=[
            pl.BlockSpec((q_tile, qc), lambda i, j: (i, 0)),
            pl.BlockSpec((kc, k_tile), lambda i, j: (0, j)),
        ],
        out_specs=pl.BlockSpec((q_tile, k_tile), lambda i, j: (i, j)),
        compiler_params=pltpu.CompilerParams(
            dimension_semantics=("parallel", "parallel")),
    )(qry_p, key_t)

    return out[:q, :k]


# ----------------------------------------------------------------------------
# Path B: bounded-vocabulary MXU count-matmul kernel.
# ----------------------------------------------------------------------------
def _iou_matmul_kernel(cntq_ref, cntk_t_ref, out_ref, *, n_cats):
    # cntq_ref:   (q_tile, V_pad) bf16 -- per-row category counts (query)
    # cntk_t_ref: (V_pad, k_tile) bf16 -- per-row category counts (key), transposed
    n_int = jnp.dot(cntq_ref[...], cntk_t_ref[...],
                    preferred_element_type=jnp.float32)
    union = jnp.float32(n_cats) - n_int
    out_ref[...] = n_int * pl.reciprocal(union)


def _category_counts(labels, num_categories):
    # (N, C) int labels in [0, V) -> (N, V) per-row counts; exact in bf16 for
    # counts < 256 (counts here are <= C, a handful).
    vocab = jnp.arange(num_categories, dtype=labels.dtype)
    onehot = (labels[:, :, None] == vocab[None, None, :]).astype(jnp.int32)
    return onehot.sum(axis=1).astype(jnp.bfloat16)


def _category_iou_matmul(qry_labels, key_labels, num_categories, *,
                         q_tile_max=256, k_tile_max=1024):
    q, qc = qry_labels.shape
    k, kc = key_labels.shape

    q_pad = _round_up(q, 8)
    k_pad = _round_up(k, 128)
    v_pad = _round_up(num_categories, 128)
    q_tile, k_tile = _pick_tiles(q_pad, k_pad, q_tile_max, k_tile_max)

    cnt_q = _category_counts(qry_labels, num_categories)            # (q, V)
    cnt_k = _category_counts(key_labels, num_categories)            # (k, V)
    cnt_q = jnp.pad(cnt_q, ((0, q_pad - q), (0, v_pad - num_categories)))
    cnt_k = jnp.pad(cnt_k, ((0, k_pad - k), (0, v_pad - num_categories)))
    cnt_k_t = cnt_k.T                                                # (V_pad, k_pad)

    kernel = functools.partial(_iou_matmul_kernel, n_cats=qc + kc)
    out = pl.pallas_call(
        kernel,
        out_shape=jax.ShapeDtypeStruct((q_pad, k_pad), jnp.float32),
        grid=(_cdiv(q_pad, q_tile), _cdiv(k_pad, k_tile)),
        in_specs=[
            pl.BlockSpec((q_tile, v_pad), lambda i, j: (i, 0)),
            pl.BlockSpec((v_pad, k_tile), lambda i, j: (0, j)),
        ],
        out_specs=pl.BlockSpec((q_tile, k_tile), lambda i, j: (i, j)),
        compiler_params=pltpu.CompilerParams(
            dimension_semantics=("parallel", "parallel")),
    )(cnt_q, cnt_k_t)

    return out[:q, :k]


# ----------------------------------------------------------------------------
# Public API / module port.
# ----------------------------------------------------------------------------
def category_iou(qry_labels, key_labels, num_categories=None):
    """Pairwise category-set IoU.

    qry_labels: (Q, QC) int, key_labels: (K, KC) int.
    If `num_categories` is given (labels known to lie in [0, V)), the MXU
    count-matmul path is used; otherwise the general compare path.
    """
    qry_labels = jnp.asarray(qry_labels, jnp.int32)
    key_labels = jnp.asarray(key_labels, jnp.int32)
    if num_categories is not None:
        return _category_iou_matmul(qry_labels, key_labels, int(num_categories))
    return _category_iou_compare(qry_labels, key_labels)


class ContrastLoss:
    """JAX/Pallas port of the PyTorch ContrastLoss module (forward is abstract)."""

    def __init__(self, reduction="mean", T=0.07):
        self.reduction = reduction
        self.T = T

    def _category_iou(self, qry_labels, key_labels, num_categories=None):
        return category_iou(qry_labels, key_labels, num_categories=num_categories)

    def forward(self, *inputs):
        raise NotImplementedError


def _category_iou_ref(qry_labels, key_labels):
    q, qc = qry_labels.shape
    k, kc = key_labels.shape
    ql = qry_labels.reshape(q, 1, qc, 1)
    kl = key_labels.reshape(1, k, 1, kc)
    n_int = (ql == kl).sum(axis=(-2, -1)).astype(jnp.float32)
    n_union = kc + qc - n_int
    return n_int / n_union


if __name__ == "__main__":
    key = jax.random.PRNGKey(0)
    kq, kk, kq2, kk2 = jax.random.split(key, 4)

    loss_mod = ContrastLoss(reduction="mean", T=0.07)

    # Small (module-scale) case: 16 query tasks x 5 cats, 24 key tasks x 6 cats.
    Q, QC, K, KC, V = 16, 5, 24, 6, 13
    qry_labels = jax.random.randint(kq, (Q, QC), 0, V, dtype=jnp.int32)
    key_labels = jax.random.randint(kk, (K, KC), 0, V, dtype=jnp.int32)
    ref = _category_iou_ref(qry_labels, key_labels)

    iou = jax.block_until_ready(loss_mod._category_iou(qry_labels, key_labels))
    assert iou.shape == (Q, K)
    assert jnp.allclose(iou, ref, rtol=1e-6, atol=1e-6), "compare-path mismatch (small)"

    iou_mxu = jax.block_until_ready(
        loss_mod._category_iou(qry_labels, key_labels, num_categories=V))
    assert iou_mxu.shape == (Q, K)
    assert jnp.allclose(iou_mxu, ref, rtol=1e-6, atol=1e-6), "MXU-path mismatch (small)"

    # Multi-tile case: exercises the 2-D (parallel, parallel) cdiv grid, the
    # ragged final block, and the pad-then-slice path.
    Q2, QC2, K2, KC2, V2 = 300, 7, 600, 6, 21
    qry2 = jax.random.randint(kq2, (Q2, QC2), 0, V2, dtype=jnp.int32)
    key2 = jax.random.randint(kk2, (K2, KC2), 0, V2, dtype=jnp.int32)
    ref2 = _category_iou_ref(qry2, key2)

    iou2 = jax.block_until_ready(loss_mod._category_iou(qry2, key2))
    assert iou2.shape == (Q2, K2)
    assert jnp.allclose(iou2, ref2, rtol=1e-6, atol=1e-6), "compare-path mismatch (tiled)"

    iou2_mxu = jax.block_until_ready(
        loss_mod._category_iou(qry2, key2, num_categories=V2))
    assert iou2_mxu.shape == (Q2, K2)
    assert jnp.allclose(iou2_mxu, ref2, rtol=1e-6, atol=1e-6), "MXU-path mismatch (tiled)"

    print("KERNEL_OK")
</pallas_src>

<mosaic_0001>
module attributes {stable_mosaic.version = 11 : i64} {
  func.func @_iou_compare_kernel(%arg0: i32, %arg1: i32, %arg2: memref<8x5xi32, #tpu.memory_space<vmem>>, %arg3: memref<6x128xi32, #tpu.memory_space<vmem>>, %arg4: memref<8x128xf32, #tpu.memory_space<vmem>>) attributes {dimension_semantics = [#tpu.dimension_semantics<parallel>, #tpu.dimension_semantics<parallel>], iteration_bounds = array<i64: 2, 1>, scalar_prefetch = 0 : i64, scratch_operands = 0 : i64, tpu.core_type = #tpu.core_type<tc>, window_params = [{transform_indices = @transform_0, window_bounds = array<i64: 8, 5>}, {transform_indices = @transform_1, window_bounds = array<i64: 6, 128>}, {transform_indices = @transform_2, window_bounds = array<i64: 8, 128>}]} {
    %c0 = arith.constant 0 : index
    %c0_0 = arith.constant 0 : index
    %0 = vector.load %arg3[%c0, %c0_0] : memref<6x128xi32, #tpu.memory_space<vmem>>, vector<1x128xi32>
    %1 = vector.shape_cast %0 : vector<1x128xi32> to vector<1x128xi32>
    %2 = vector.broadcast %1 : vector<1x128xi32> to vector<8x128xi32>
    %c1 = arith.constant 1 : index
    %c0_1 = arith.constant 0 : index
    %3 = vector.load %arg3[%c1, %c0_1] : memref<6x128xi32, #tpu.memory_space<vmem>>, vector<1x128xi32>
    %4 = vector.shape_cast %3 : vector<1x128xi32> to vector<1x128xi32>
    %5 = vector.broadcast %4 : vector<1x128xi32> to vector<8x128xi32>
    %c2 = arith.constant 2 : index
    %c0_2 = arith.constant 0 : index
    %6 = vector.load %arg3[%c2, %c0_2] : memref<6x128xi32, #tpu.memory_space<vmem>>, vector<1x128xi32>
    %7 = vector.shape_cast %6 : vector<1x128xi32> to vector<1x128xi32>
    %8 = vector.broadcast %7 : vector<1x128xi32> to vector<8x128xi32>
    %c3 = arith.constant 3 : index
    %c0_3 = arith.constant 0 : index
    %9 = vector.load %arg3[%c3, %c0_3] : memref<6x128xi32, #tpu.memory_space<vmem>>, vector<1x128xi32>
    %10 = vector.shape_cast %9 : vector<1x128xi32> to vector<1x128xi32>
    %11 = vector.broadcast %10 : vector<1x128xi32> to vector<8x128xi32>
    %c4 = arith.constant 4 : index
    %c0_4 = arith.constant 0 : index
    %12 = vector.load %arg3[%c4, %c0_4] : memref<6x128xi32, #tpu.memory_space<vmem>>, vector<1x128xi32>
    %13 = vector.shape_cast %12 : vector<1x128xi32> to vector<1x128xi32>
    %14 = vector.broadcast %13 : vector<1x128xi32> to vector<8x128xi32>
    %c5 = arith.constant 5 : index
    %c0_5 = arith.constant 0 : index
    %15 = vector.load %arg3[%c5, %c0_5] : memref<6x128xi32, #tpu.memory_space<vmem>>, vector<1x128xi32>
    %16 = vector.shape_cast %15 : vector<1x128xi32> to vector<1x128xi32>
    %17 = vector.broadcast %16 : vector<1x128xi32> to vector<8x128xi32>
    %c0_i32 = arith.constant 0 : i32
    %c8_i32 = arith.constant 8 : i32
    %18 = arith.muli %c0_i32, %c8_i32 : i32
    %19 = tpu.assume_multiple %18, 8 : i32
    %20 = arith.index_cast %19 : i32 to index
    %c0_6 = arith.constant 0 : index
    %21 = vector.load %arg2[%20, %c0_6] : memref<8x5xi32, #tpu.memory_space<vmem>>, vector<8x5xi32>
    %c0_i32_7 = arith.constant 0 : i32
    %22 = vector.broadcast %c0_i32_7 : i32 to vector<8x128xi32>
    %23 = vector.extract_strided_slice %21 {offsets = [0, 0], sizes = [8, 1], strides = [1, 1]} : vector<8x5xi32> to vector<8x1xi32>
    %24 = vector.shape_cast %23 : vector<8x1xi32> to vector<8x1xi32>
    %25 = vector.broadcast %24 : vector<8x1xi32> to vector<8x128xi32>
    %26 = arith.cmpi eq, %25, %2 : vector<8x128xi32>
    %27 = arith.extui %26 : vector<8x128xi1> to vector<8x128xi32>
    %28 = arith.addi %22, %27 : vector<8x128xi32>
    %29 = arith.cmpi eq, %25, %5 : vector<8x128xi32>
    %30 = arith.extui %29 : vector<8x128xi1> to vector<8x128xi32>
    %31 = arith.addi %28, %30 : vector<8x128xi32>
    %32 = arith.cmpi eq, %25, %8 : vector<8x128xi32>
    %33 = arith.extui %32 : vector<8x128xi1> to vector<8x128xi32>
    %34 = arith.addi %31, %33 : vector<8x128xi32>
    %35 = arith.cmpi eq, %25, %11 : vector<8x128xi32>
    %36 = arith.extui %35 : vector<8x128xi1> to vector<8x128xi32>
    %37 = arith.addi %34, %36 : vector<8x128xi32>
    %38 = arith.cmpi eq, %25, %14 : vector<8x128xi32>
    %39 = arith.extui %38 : vector<8x128xi1> to vector<8x128xi32>
    %40 = arith.addi %37, %39 : vector<8x128xi32>
    %41 = arith.cmpi eq, %25, %17 : vector<8x128xi32>
    %42 = arith.extui %41 : vector<8x128xi1> to vector<8x128xi32>
    %43 = arith.addi %40, %42 : vector<8x128xi32>
    %44 = vector.extract_strided_slice %21 {offsets = [0, 1], sizes = [8, 1], strides = [1, 1]} : vector<8x5xi32> to vector<8x1xi32>
    %45 = vector.shape_cast %44 : vector<8x1xi32> to vector<8x1xi32>
    %46 = vector.broadcast %45 : vector<8x1xi32> to vector<8x128xi32>
    %47 = arith.cmpi eq, %46, %2 : vector<8x128xi32>
    %48 = arith.extui %47 : vector<8x128xi1> to vector<8x128xi32>
    %49 = arith.addi %43, %48 : vector<8x128xi32>
    %50 = arith.cmpi eq, %46, %5 : vector<8x128xi32>
    %51 = arith.extui %50 : vector<8x128xi1> to vector<8x128xi32>
    %52 = arith.addi %49, %51 : vector<8x128xi32>
    %53 = arith.cmpi eq, %46, %8 : vector<8x128xi32>
    %54 = arith.extui %53 : vector<8x128xi1> to vector<8x128xi32>
    %55 = arith.addi %52, %54 : vector<8x128xi32>
    %56 = arith.cmpi eq, %46, %11 : vector<8x128xi32>
    %57 = arith.extui %56 : vector<8x128xi1> to vector<8x128xi32>
    %58 = arith.addi %55, %57 : vector<8x128xi32>
    %59 = arith.cmpi eq, %46, %14 : vector<8x128xi32>
    %60 = arith.extui %59 : vector<8x128xi1> to vector<8x128xi32>
    %61 = arith.addi %58, %60 : vector<8x128xi32>
    %62 = arith.cmpi eq, %46, %17 : vector<8x128xi32>
    %63 = arith.extui %62 : vector<8x128xi1> to vector<8x128xi32>
    %64 = arith.addi %61, %63 : vector<8x128xi32>
    %65 = vector.extract_strided_slice %21 {offsets = [0, 2], sizes = [8, 1], strides = [1, 1]} : vector<8x5xi32> to vector<8x1xi32>
    %66 = vector.shape_cast %65 : vector<8x1xi32> to vector<8x1xi32>
    %67 = vector.broadcast %66 : vector<8x1xi32> to vector<8x128xi32>
    %68 = arith.cmpi eq, %67, %2 : vector<8x128xi32>
    %69 = arith.extui %68 : vector<8x128xi1> to vector<8x128xi32>
    %70 = arith.addi %64, %69 : vector<8x128xi32>
    %71 = arith.cmpi eq, %67, %5 : vector<8x128xi32>
    %72 = arith.extui %71 : vector<8x128xi1> to vector<8x128xi32>
    %73 = arith.addi %70, %72 : vector<8x128xi32>
    %74 = arith.cmpi eq, %67, %8 : vector<8x128xi32>
    %75 = arith.extui %74 : vector<8x128xi1> to vector<8x128xi32>
    %76 = arith.addi %73, %75 : vector<8x128xi32>
    %77 = arith.cmpi eq, %67, %11 : vector<8x128xi32>
    %78 = arith.extui %77 : vector<8x128xi1> to vector<8x128xi32>
    %79 = arith.addi %76, %78 : vector<8x128xi32>
    %80 = arith.cmpi eq, %67, %14 : vector<8x128xi32>
    %81 = arith.extui %80 : vector<8x128xi1> to vector<8x128xi32>
    %82 = arith.addi %79, %81 : vector<8x128xi32>
    %83 = arith.cmpi eq, %67, %17 : vector<8x128xi32>
    %84 = arith.extui %83 : vector<8x128xi1> to vector<8x128xi32>
    %85 = arith.addi %82, %84 : vector<8x128xi32>
    %86 = vector.extract_strided_slice %21 {offsets = [0, 3], sizes = [8, 1], strides = [1, 1]} : vector<8x5xi32> to vector<8x1xi32>
    %87 = vector.shape_cast %86 : vector<8x1xi32> to vector<8x1xi32>
    %88 = vector.broadcast %87 : vector<8x1xi32> to vector<8x128xi32>
    %89 = arith.cmpi eq, %88, %2 : vector<8x128xi32>
    %90 = arith.extui %89 : vector<8x128xi1> to vector<8x128xi32>
    %91 = arith.addi %85, %90 : vector<8x128xi32>
    %92 = arith.cmpi eq, %88, %5 : vector<8x128xi32>
    %93 = arith.extui %92 : vector<8x128xi1> to vector<8x128xi32>
    %94 = arith.addi %91, %93 : vector<8x128xi32>
    %95 = arith.cmpi eq, %88, %8 : vector<8x128xi32>
    %96 = arith.extui %95 : vector<8x128xi1> to vector<8x128xi32>
    %97 = arith.addi %94, %96 : vector<8x128xi32>
    %98 = arith.cmpi eq, %88, %11 : vector<8x128xi32>
    %99 = arith.extui %98 : vector<8x128xi1> to vector<8x128xi32>
    %100 = arith.addi %97, %99 : vector<8x128xi32>
    %101 = arith.cmpi eq, %88, %14 : vector<8x128xi32>
    %102 = arith.extui %101 : vector<8x128xi1> to vector<8x128xi32>
    %103 = arith.addi %100, %102 : vector<8x128xi32>
    %104 = arith.cmpi eq, %88, %17 : vector<8x128xi32>
    %105 = arith.extui %104 : vector<8x128xi1> to vector<8x128xi32>
    %106 = arith.addi %103, %105 : vector<8x128xi32>
    %107 = vector.extract_strided_slice %21 {offsets = [0, 4], sizes = [8, 1], strides = [1, 1]} : vector<8x5xi32> to vector<8x1xi32>
    %108 = vector.shape_cast %107 : vector<8x1xi32> to vector<8x1xi32>
    %109 = vector.broadcast %108 : vector<8x1xi32> to vector<8x128xi32>
    %110 = arith.cmpi eq, %109, %2 : vector<8x128xi32>
    %111 = arith.extui %110 : vector<8x128xi1> to vector<8x128xi32>
    %112 = arith.addi %106, %111 : vector<8x128xi32>
    %113 = arith.cmpi eq, %109, %5 : vector<8x128xi32>
    %114 = arith.extui %113 : vector<8x128xi1> to vector<8x128xi32>
    %115 = arith.addi %112, %114 : vector<8x128xi32>
    %116 = arith.cmpi eq, %109, %8 : vector<8x128xi32>
    %117 = arith.extui %116 : vector<8x128xi1> to vector<8x128xi32>
    %118 = arith.addi %115, %117 : vector<8x128xi32>
    %119 = arith.cmpi eq, %109, %11 : vector<8x128xi32>
    %120 = arith.extui %119 : vector<8x128xi1> to vector<8x128xi32>
    %121 = arith.addi %118, %120 : vector<8x128xi32>
    %122 = arith.cmpi eq, %109, %14 : vector<8x128xi32>
    %123 = arith.extui %122 : vector<8x128xi1> to vector<8x128xi32>
    %124 = arith.addi %121, %123 : vector<8x128xi32>
    %125 = arith.cmpi eq, %109, %17 : vector<8x128xi32>
    %126 = arith.extui %125 : vector<8x128xi1> to vector<8x128xi32>
    %127 = arith.addi %124, %126 : vector<8x128xi32>
    %128 = arith.sitofp %127 : vector<8x128xi32> to vector<8x128xf32>
    %cst = arith.constant 1.100000e+01 : f32
    %129 = vector.broadcast %cst : f32 to vector<8x128xf32>
    %130 = arith.subf %129, %128 : vector<8x128xf32>
    %131 = tpu.reciprocal %130 : vector<8x128xf32> -> vector<8x128xf32>
    %132 = arith.mulf %128, %131 : vector<8x128xf32>
    %133 = arith.index_cast %19 : i32 to index
    %c0_8 = arith.constant 0 : index
    %134 = vector.load %arg4[%133, %c0_8] : memref<8x128xf32, #tpu.memory_space<vmem>>, vector<8x128xf32>
    tpu.vector_store %arg4[%133, %c0_8], %132 {strides = array<i32>} : memref<8x128xf32, #tpu.memory_space<vmem>>, vector<8x128xf32>,
    %c1_i32 = arith.constant 1 : i32
    return
  }
  func.func @transform_0(%arg0: i32, %arg1: i32) -> (i32, i32) {
    %c0_i32 = arith.constant 0 : i32
    %c0_i32_0 = arith.constant 0 : i32
    return %arg0, %c0_i32 : i32, i32
  }
  func.func @transform_1(%arg0: i32, %arg1: i32) -> (i32, i32) {
    %c0_i32 = arith.constant 0 : i32
    %c0_i32_0 = arith.constant 0 : i32
    return %c0_i32, %arg1 : i32, i32
  }
  func.func @transform_2(%arg0: i32, %arg1: i32) -> (i32, i32) {
    %c0_i32 = arith.constant 0 : i32
    return %arg0, %arg1 : i32, i32
  }
}

</mosaic_0001>

<bundles_post_ra>
// kernel: tpu_custom_call.1
= control target key start
LH: loop header
LB: loop body
LE: loop exit
PB: predicated region body
PF: predicated region fallthrough
CT: control target
= control target key end

     0   :  { %7 = vsyncpa [#allocation3], 0  ;;  %s798_s0 = inlined_call_operand.vmem [shape: s32[16,5], index: 0, kind: input, shape index: {}]   ;;  %s799_s1 = inlined_call_operand.vmem [shape: s32[6,128], index: 1, kind: input, shape index: {}]   ;;  %s800_s2 = inlined_call_operand.hbm [shape: f32[16,128], index: 2, kind: output, shape index: {}]  }
   0x1   :  { %9 = vsyncpa [#allocation3 + $0x1], 0  ;;  %s595_s9 = smov 0   ;;  %s597_s10 = smov 0  }
   0x2   :  { %s599_s11 = smov 0   ;;  %s601_s12 = smov 0  }
   0x3   :  { %s603_s13 = smov 0   ;;  %s605_s14 = smov 0  }
   0x4 LB: > { %s408_s15 = sadd.s32 4294967295, %s572_s14   ;;  %s409_s16 = sadd.s32 4294967294, %s572_s14   ;;  %s572_s14 = sphi %s605_s14, %s15_s14   ;;  %s568_s13 = sphi %s603_s13, %s807_s13   ;;  %s564_s12 = sphi %s601_s12, %s806_s12   ;;  %s560_s11 = sphi %s599_s11, %s805_s11   ;;  %s556_s10 = sphi %s597_s10, %s804_s10   ;;  %s552_s9 = sphi %s595_s9, %s803_s9  }
   0x5   : > { %s27_s17 = sadd.s32 1, %s568_s13  ;;  %s88_s18 = sadd.s32 1, %s560_s11 }
   0x6   : > { %p29_p0 = scmp.ge.s32.totalorder %s27_s17, 2  ;;  %p98_p1 = scmp.ne.s32.totalorder %s560_s11, %s556_s10 }
   0x7   : > { %p99_p2 = scmp.eq.s32.totalorder %s408_s15, 1  ;;  %p104_p3 = scmp.ne.s32.totalorder %s556_s10, %s552_s9 }
   0x8   : > { %s809_s17 = smov (%p29_p0, %s27_s17), 0  ;;  %p105_p5 = scmp.eq.s32.totalorder %s409_s16, 1 }
   0x9   : > { %p635_p4 = por %p99_p2, %p98_p1  ;;  %s83_s20 = ssub.s32 %s568_s13, %s809_s17 }
   0xa   : > { %p413_p6 = scmp.ge.s32.totalorder %s572_s14, 1  ;;  %p86_p7 = scmp.eq.s32.totalorder %s83_s20, 0 }
   0xb   : > { %p642_p8 = por %p105_p5, %p104_p3  ;;  %p137_p9 = scmp.lt.s32.totalorder %s572_s14, 3 }
   0xc   : > { %s648_s22 = scalar_select %p86_p7, %s560_s11, %s88_s18  }
   0xd   : > { %p138_p10 = pnand %p413_p6, %p137_p9 }
   0xe   : > { %p162_p11 = scmp.lt.s32.totalorder (!%p138_p10), %s564_s12, 1  ;;  %v574_v0 = vmov (!%p138_p10), 0   ;;  %v575_v1 = vmov (!%p138_p10), 2   ;;  %v576_v3 = vmov (!%p138_p10), 1   ;;  %v577_v4 = vmov (!%p138_p10), 3   ;;  %s159_s20 = sand.u32 (!%p138_p10), 1, %s556_s10  }
   0xf   : > { %141 = sbr.rel (%p138_p10) target bundleno = 246 (0xf6), region = 28  ;;  %486 = vset.pattern.permute.xlu0 (!%p138_p10), %v574_v0  ;;  %488 = vset.pattern.permute.xlu1 (!%p138_p10), %v575_v1  ;;  %v578_v5 = vmov (!%p138_p10), 4   ;;  %v659_v6 = vld [vmem:[%s799_s1] ss:$0 sm:$0xff] (!%p138_p10)  ;;  %v664_v7 = vld [vmem:[%s799_s1 + $0x1] ss:$0 sm:$0xff] (!%p138_p10) }
  0x10   : > { %v669_v8 = vld [vmem:[%s799_s1 + $0x2] ss:$0 sm:$0xff] (!%p138_p10)  ;;  %v674_v9 = vld [vmem:[%s799_s1 + $0x3] ss:$0 sm:$0xff] (!%p138_p10)  ;;  %v682_v11 = vld [vmem:[%s799_s1 + $0x4] ss:$0 sm:$0xff] (!%p138_p10) }
  0x11   : > { %v690_v15 = vld [vmem:[%s799_s1 + $0x5] ss:$0 sm:$0xff] (!%p138_p10)  ;;  %s311_s30 = scalar_lea.sflag (!%p138_p10), [#allocation3], %s159_s20 }
  0x16   : > { %s163_s23 = scalar_select %p162_p11, %s564_s12, 1 }
  0x18   : > { %s415_s24 = sshll.u32 %s163_s23, 3  ;;  %s414_s23 = sshll.u32 %s159_s20, 3 }
  0x19   : > { %s165_s27 = scalar_lea.vmem %s798_s0, %s415_s24  ;;  %s423_s24 = sshll.u32 %s564_s12, 7 }
  0x1a   : > { %v200_v2 = vld [vmem:[%s165_s27] sm:$0xff]  ;;  %s161_s25 = scalar_lea.vmem [#allocation2], %s414_s23  ;;  %s751_s29 = scalar_lea.hbm %s800_s2, %s423_s24 }
  0x1b   : > { %202 = vperm.xlu0 %486, %v200_v2   ;;  %243 = vperm.xlu1 %488, %v200_v2   ;;  %s325_s26 = sshll.u32 %s161_s25, 4  ;;  %s579_s12 = smov [#allocation2]   ;;  %s753_s26 = int_to_ptr.vmem [resolvable:$true] %s325_s26 }
  0x1c   : > { %s494_s3 = scalar_lea.vmem %s753_s26, 128  ;;  %s498_s4 = sshll.u32 %s579_s12, 4  ;;  %s499_s4 = int_to_ptr.vmem [resolvable:$false] %s498_s4 }
  0x1d   : > { %p495_p12 = scmp.ne.s32.totalorder %s753_s26, %s494_s3  ;;  %s500_s5 = scalar_lea.vmem %s499_s4, 256 }
  0x1e   : > { %p501_p1 = scmp.lt.s32.totalorder %s753_s26, %s499_s4  ;;  %p502_p2 = scmp.lt.s32.totalorder %s500_s5, %s494_s3 }
  0x1f   : > { %487 = vset.pattern.permute.xlu0 %v576_v3  ;;  %489 = vset.pattern.permute.xlu1 %v577_v4  ;;  %p496_p13 = pnand %p495_p12, %p635_p4 }
  0x20   : > { %222 = vperm.xlu0 %487, %v200_v2   ;;  %264 = vperm.xlu1 %489, %v200_v2   ;;  %p503_p3 = por %p502_p2, %p501_p1 }
  0x21   : > { %p497_p0 = pneg %p496_p13 }
  0x23   : > { %p504_p5 = pnand %p503_p3, %p497_p0 }
  0x24   : > { %490 = vset.pattern.permute.xlu1 %v578_v5  ;;  %491 = vset.pattern.permute.xlu0 %v578_v5 }
  0x25   : > { %285 = vperm.xlu1 %490, %v200_v2  }
  0x9a   : > { %v203_v10 = vpop.permute.xlu0 %202  ;;  %v244_v30 = vpop.permute.xlu1 %243 }
  0x9b   : > { %vm204_vm0 = vcmp.eq.s32.totalorder %v203_v10, %v659_v6  ;;  %vm206_vm1 = vcmp.eq.s32.totalorder %v203_v10, %v664_v7  ;;  %vm209_vm2 = vcmp.eq.s32.totalorder %v203_v10, %v669_v8  ;;  %vm212_vm3 = vcmp.eq.s32.totalorder %v203_v10, %v674_v9 }
  0x9c   : > { %v205_v12 = vsel %vm204_vm0, 1, %v574_v0  ;;  %v207_v13 = vsel %vm206_vm1, 1, %v574_v0  ;;  %v210_v16 = vsel %vm209_vm2, 1, %v574_v0  ;;  %vm215_vm4 = vcmp.eq.s32.totalorder %v203_v10, %v682_v11 }
  0x9d   : > { %v208_v14 = vadd.s32 %v207_v13, %v205_v12  ;;  %v213_v19 = vsel %vm212_vm3, 1, %v574_v0  ;;  %vm218_vm5 = vcmp.eq.s32.totalorder %v203_v10, %v690_v15  ;;  %v216_v21 = vsel %vm215_vm4, 1, %v574_v0 }
  0x9e   : > { %v219_v23 = vsel %vm218_vm5, 1, %v574_v0  ;;  %vm245_vm12 = vcmp.eq.s32.totalorder %v244_v30, %v659_v6  ;;  %vm248_vm13 = vcmp.eq.s32.totalorder %v244_v30, %v664_v7  ;;  %vm251_vm14 = vcmp.eq.s32.totalorder %v244_v30, %v669_v8 }
  0x9f   : > { %v211_v17 = vadd.s32 %v210_v16, %v208_v14  ;;  %v223_v18 = vpop.permute.xlu0 %222  ;;  %v246_v37 = vsel %vm245_vm12, 1, %v574_v0  ;;  %v249_v40 = vsel %vm248_vm13, 1, %v574_v0  ;;  %vm254_vm15 = vcmp.eq.s32.totalorder %v244_v30, %v674_v9  ;;  %v265_v43 = vpop.permute.xlu1 %264 }
  0xa0   : > { %vm224_vm6 = vcmp.eq.s32.totalorder %v223_v18, %v659_v6  ;;  %vm227_vm7 = vcmp.eq.s32.totalorder %v223_v18, %v664_v7  ;;  %vm230_vm8 = vcmp.eq.s32.totalorder %v223_v18, %v669_v8  ;;  %vm233_vm9 = vcmp.eq.s32.totalorder %v223_v18, %v674_v9 }
  0xa1   : > { %v214_v20 = vadd.s32 %v213_v19, %v211_v17  ;;  %v225_v24 = vsel %vm224_vm6, 1, %v574_v0  ;;  %v228_v27 = vsel %vm227_vm7, 1, %v574_v0  ;;  %v231_v29 = vsel %vm230_vm8, 1, %v574_v0 }
  0xa2   : > { %vm236_vm10 = vcmp.eq.s32.totalorder %v223_v18, %v682_v11  ;;  %v234_v32 = vsel %vm233_vm9, 1, %v574_v0  ;;  %vm239_vm11 = vcmp.eq.s32.totalorder %v223_v18, %v690_v15  ;;  %v252_v42 = vsel %vm251_vm14, 1, %v574_v0 }
  0xa3   : > { %v217_v22 = vadd.s32 %v216_v21, %v214_v20  ;;  %v237_v34 = vsel %vm236_vm10, 1, %v574_v0  ;;  %v240_v36 = vsel %vm239_vm11, 1, %v574_v0  ;;  %vm257_vm0 = vcmp.eq.s32.totalorder %v244_v30, %v682_v11 }
  0xa4   : > { %v255_v45 = vsel %vm254_vm15, 1, %v574_v0  ;;  %vm260_vm1 = vcmp.eq.s32.totalorder %v244_v30, %v690_v15  ;;  %vm266_vm2 = vcmp.eq.s32.totalorder %v265_v43, %v659_v6  ;;  %v258_v47 = vsel %vm257_vm0, 1, %v574_v0  ;;  %v286_v56 = vpop.permute.xlu1 %285 }
  0xa5   : > { %v220_v25 = vadd.s32 %v219_v23, %v217_v22  ;;  %v261_v49 = vsel %vm260_vm1, 1, %v574_v0  ;;  %v267_v50 = vsel %vm266_vm2, 1, %v574_v0  ;;  %vm269_vm3 = vcmp.eq.s32.totalorder %v265_v43, %v664_v7 }
  0xa6   : > { %vm272_vm4 = vcmp.eq.s32.totalorder %v265_v43, %v669_v8  ;;  %v270_v53 = vsel %vm269_vm3, 1, %v574_v0  ;;  %vm275_vm5 = vcmp.eq.s32.totalorder %v265_v43, %v674_v9  ;;  %vm278_vm6 = vcmp.eq.s32.totalorder %v265_v43, %v682_v11 }
  0xa7   : > { %v226_v26 = vadd.s32 %v225_v24, %v220_v25  ;;  %v273_v55 = vsel %vm272_vm4, 1, %v574_v0  ;;  %v276_v58 = vsel %vm275_vm5, 1, %v574_v0  ;;  %vm281_vm7 = vcmp.eq.s32.totalorder %v265_v43, %v690_v15 }
  0xa8   : > { %vm287_vm8 = vcmp.eq.s32.totalorder %v286_v56, %v659_v6  ;;  %v279_v60 = vsel %vm278_vm6, 1, %v574_v0  ;;  %v282_v62 = vsel %vm281_vm7, 1, %v574_v0  ;;  %vm290_vm9 = vcmp.eq.s32.totalorder %v286_v56, %v664_v7 }
  0xa9   : > { %v229_v28 = vadd.s32 %v228_v27, %v226_v26  ;;  %v288_v63 = vsel %vm287_vm8, 1, %v574_v0  ;;  %vm293_vm10 = vcmp.eq.s32.totalorder %v286_v56, %v669_v8  ;;  %v291_v3 = vsel %vm290_vm9, 1, %v574_v0 }
  0xaa   : > { %vm296_vm11 = vcmp.eq.s32.totalorder %v286_v56, %v674_v9  ;;  %v294_v5 = vsel %vm293_vm10, 1, %v574_v0  ;;  %vm299_vm12 = vcmp.eq.s32.totalorder %v286_v56, %v682_v11  ;;  %vm302_vm13 = vcmp.eq.s32.totalorder %v286_v56, %v690_v15 }
  0xab   : > { %v232_v31 = vadd.s32 %v231_v29, %v229_v28  ;;  %v297_v10 = vsel %vm296_vm11, 1, %v574_v0  ;;  %v300_v7 = vsel %vm299_vm12, 1, %v574_v0  ;;  %v303_v13 = vsel %vm302_vm13, 1, %v574_v0 }
  0xad   : > { %v235_v33 = vadd.s32 %v234_v32, %v232_v31 }
  0xaf   : > { %v238_v35 = vadd.s32 %v237_v34, %v235_v33 }
  0xb1   : > { %v241_v38 = vadd.s32 %v240_v36, %v238_v35 }
  0xb3   : > { %v247_v39 = vadd.s32 %v246_v37, %v241_v38 }
  0xb5   : > { %v250_v41 = vadd.s32 %v249_v40, %v247_v39 }
  0xb7   : > { %v253_v44 = vadd.s32 %v252_v42, %v250_v41 }
  0xb9   : > { %v256_v46 = vadd.s32 %v255_v45, %v253_v44 }
  0xbb   : > { %v259_v48 = vadd.s32 %v258_v47, %v256_v46 }
  0xbd   : > { %v262_v51 = vadd.s32 %v261_v49, %v259_v48 }
  0xbf   : > { %v268_v52 = vadd.s32 %v267_v50, %v262_v51 }
  0xc1   : > { %v271_v54 = vadd.s32 %v270_v53, %v268_v52 }
  0xc3   : > { %v274_v57 = vadd.s32 %v273_v55, %v271_v54 }
  0xc5   : > { %v277_v59 = vadd.s32 %v276_v58, %v274_v57 }
  0xc7   : > { %v280_v61 = vadd.s32 %v279_v60, %v277_v59 }
  0xc9   : > { %v283_v1 = vadd.s32 %v282_v62, %v280_v61 }
  0xcb   : > { %v289_v2 = vadd.s32 %v288_v63, %v283_v1 }
  0xcd   : > { %v292_v4 = vadd.s32 %v291_v3, %v289_v2 }
  0xcf   : > { %v295_v6 = vadd.s32 %v294_v5, %v292_v4 }
  0xd1   : > { %v298_v12 = vadd.s32 %v297_v10, %v295_v6 }
  0xd3   : > { %v301_v8 = vadd.s32 %v300_v7, %v298_v12 }
  0xd5   : > { %v304_v14 = vadd.s32 %v303_v13, %v301_v8 }
  0xd7   : > { %v305_v16 = vcvt.s32.f32 %v304_v14 }
  0xd9   : > { %v306_v9 = vsub.f32 11.0, %v305_v16 }
  0xdb   : > { %492 = vrcp.f32 %v306_v9 }
  0xe5   : > { %v493_v11 = vpop.eup %492 }
  0xe6   : > { %v308_v17 = vmul.f32 %v493_v11, %v305_v16 }
  0xe8   : > { %309 = vst [vmem:[%s161_s25] sm:$0xff] %v308_v17 }
  0xe9   : > { %507 = shalt.err (!%p504_p5)
}
  0xea   : > { %s508_s6 = scalar_lea.hbm %s751_s29, 128  ;;  %s512_s15 = scalar_lea.hbm %s800_s2, 256 }
  0xeb   : > { %p509_p6 = scmp.ne.s32.totalorder %s751_s29, %s508_s6  ;;  %p513_p10 = scmp.lt.u32.totalorder %s751_s29, %s800_s2 }
  0xec   : > { %p514_p11 = scmp.lt.u32.totalorder %s512_s15, %s508_s6  ;;  %p516_p13 = scmp.lt.u32.totalorder %s508_s6, %s751_s29 }
  0xed   : > { %p510_p7 = pnand %p509_p6, %p635_p4 }
  0xee   : > { %p515_p12 = por %p514_p11, %p513_p10 }
  0xef   : > { %p511_p9 = pneg %p510_p7 }
  0xf0   : > { %p517_p0 = por %p516_p13, %p515_p12 }
  0xf2   : > { %p518_p1 = pnand %p517_p0, %p511_p9 }
  0xf4   : > { %521 = shalt.err (!%p518_p1)
}
  0xf5   : > { %426 = dma.vmem_to_hbm [thread:$0]  (%p635_p4), %s753_s26, 128, %s751_s29, %s311_s30  }
  0xf6 PF: > { %p432_p2 = scmp.ge.s32.totalorder %s572_s14, 2  ;;  %s337_s20 = sand.u32 1, %s552_s9  }
  0xf7   : > { %s338_s23 = scalar_lea.sflag [#allocation3], %s337_s20 }
  0xf8   : > { %p429_p3 = pnand %p432_p2, %p642_p8 }
  0xfa   : > { %547 = dma.done.wait (!%p429_p3), %s338_s23, 128  }
  0xfb   : > { %549 = vsyncadd (!%p429_p3), %s338_s23, 4294967168  ;;  %s15_s14 = sadd.s32 1, %s572_s14   ;;  %s803_s9 = smov %s556_s10 }
  0xfc   : > { %p12_p5 = scmp.ge.s32.totalorder %s15_s14, 4   ;;  %s804_s10 = smov %s560_s11 }
  0xfd   : > { %s805_s11 = smov %s648_s22  ;;  %s806_s12 = smov %s568_s13 }
  0xfe   : > { %s807_s13 = smov %s809_s17  ;;  %14 = sbr.rel (!%p12_p5) target bundleno = 4 (0x4), region = 66 }
 0x105   :  { %343 = vsyncpa [#allocation3], 1 }
 0x106   :  { %345 = vsyncpa [#allocation3 + $0x1], 1 }

</bundles_post_ra>
